<compile_context>
chip_gen: v7x
topology: tpu7x:2x2x1
jax: 0.10.0
libtpu: 0.0.40
codegen_flags: <defaults>
</compile_context>

<pallas_src>
import jax
import jax.numpy as jnp
from jax import lax
from jax.experimental import pallas as pl
from jax.experimental.pallas import tpu as pltpu
import numpy as np

EPS = 1e-10
_OUT_LANES = 128  # lane-dense output block (unmasked vst)


def _sum_all(x):
    # full 2-D sum kept as a (1, 1) array (keepdims reductions lower cleanly)
    return jnp.sum(jnp.sum(x, axis=1, keepdims=True), axis=0, keepdims=True)


# --------------------------- kernel 1: cross term ---------------------------
def _cross_kernel(t1_ref, t2_ref, v1_ref, v2_ref, out_ref):
    p = pl.program_id(1)
    t = pl.program_id(2)
    ntp = pl.num_programs(2)
    TN = t1_ref.shape[1]

    T1t = t1_ref[0]                    # (TN, Np)  streamed (bf16)
    T2t = t2_ref[0]
    V1f = v1_ref[0]                    # (Np, Dv)  resident
    V2f = v2_ref[0]
    pre1 = jnp.dot(T1t, V1f, preferred_element_type=jnp.float32)   # (TN, Dv)
    pre2 = jnp.dot(T2t, V2f, preferred_element_type=jnp.float32)

    # slice the matching row tile of V out of the resident block (no extra stream)
    row0 = pl.multiple_of((p * ntp + t) * TN, 8)
    v1t = v1_ref[:, pl.ds(row0, TN), :][0].astype(jnp.float32)
    v2t = v2_ref[:, pl.ds(row0, TN), :][0].astype(jnp.float32)

    d1 = pre1 - v1t
    d2 = pre2 - v2t
    part = _sum_all(d1 * d1) + _sum_all(d2 * d2)                    # (1, 1)
    part = jnp.broadcast_to(part.reshape(1, 1, 1), out_ref.shape)   # lane-dense

    @pl.when(t == 0)
    def _():
        out_ref[...] = part

    @pl.when(t > 0)
    def _():
        out_ref[...] += part


# ------------------ kernel 2: per-batch cos / res / ortho / bij ------------------
def _terms_kernel(cresm_ref, cresp_ref, crows_ref, ccols_ref,
                  f1m_ref, f1p_ref, f2m_ref, f2p_ref, out_ref):
    def cos_sum(a_ref, b_ref):
        a = a_ref[0]                                  # (D, N): reduce over sublanes
        b = b_ref[0]
        dot = jnp.sum(a * b, axis=0, keepdims=True)   # (1, N)
        sa = jnp.sum(a * a, axis=0, keepdims=True)
        sb = jnp.sum(b * b, axis=0, keepdims=True)
        cos = dot * lax.rsqrt(jnp.maximum(sa * sb, EPS * EPS))
        return jnp.sum(cos, axis=1, keepdims=True)    # (1, 1)

    cos1 = cos_sum(f1m_ref, f1p_ref)
    cos2 = cos_sum(f2m_ref, f2p_ref)

    # residual term on lane-dense flattened C (1, 2*K*K)
    dC = cresm_ref[0] - cresp_ref[0]
    res = jnp.sum(dC * dC, axis=1, keepdims=True)

    # fused ortho + bij:
    #   A  = [C12p ; C21p] (2K, K),  Bc = [C21p | C12p] (K, 2K)
    #   diag blocks of A A^T  are C12 C12^T and C21 C21^T
    #   diag blocks of A Bc   are C12 C21   and C21 C12
    A = crows_ref[0]
    Bc = ccols_ref[0]
    AAt = lax.dot_general(A, A, (((1,), (1,)), ((), ())),
                          preferred_element_type=jnp.float32)        # (2K, 2K)
    AB = jnp.dot(A, Bc, preferred_element_type=jnp.float32)          # (2K, 2K)

    twoK = A.shape[0]
    K = A.shape[1]
    row = lax.broadcasted_iota(jnp.int32, (twoK, twoK), 0)
    col = lax.broadcasted_iota(jnp.int32, (twoK, twoK), 1)
    eye2 = (row == col).astype(jnp.float32)
    mask = ((row < K) == (col < K)).astype(jnp.float32)   # keep only diag K x K blocks

    do = mask * (AAt - eye2)
    db = mask * (AB - eye2)
    ortho = _sum_all(do * do)
    bij = _sum_all(db * db)

    # single lane-dense write: lanes 0..4 = cos1, cos2, res, ortho, bij
    vals = jnp.concatenate([cos1, cos2, res, ortho, bij], axis=1)     # (1, 5)
    lanes = out_ref.shape[-1]
    pad = jnp.zeros((1, lanes - vals.shape[1]), jnp.float32)
    out_ref[...] = jnp.concatenate([vals, pad], axis=1).reshape(1, 1, lanes)


# ------------------------------- wrapper ----------------------------------
def _round_up(x, m):
    return ((x + m - 1) // m) * m


def _vmem_capacity_bytes():
    try:
        return int(pltpu.get_tpu_info().vmem_capacity_bytes)
    except Exception:
        return 64 << 20      # conservative (v7x-sized) fallback


def _pick_row_tile(n, budget_bytes, bytes_per_elem):
    """Pick the T row-tile size and the (possibly padded) vertex count Np."""
    cands = sorted({2048, 1024, 512, 256, 128, 64, 32, 16, 8, _round_up(n, 8)},
                   reverse=True)
    feasible = [c for c in cands
                if 2 * 2 * c * _round_up(n, c) * bytes_per_elem <= budget_bytes]
    if not feasible:
        feasible = [8]
    for c in feasible:                       # prefer exact divisors, largest first
        if n % c == 0:
            return c, n
    # otherwise allow a small amount of zero padding and take the largest tile
    slack = n + max(n // 16, 8)
    pool = [c for c in feasible if _round_up(n, c) <= slack] or feasible
    c = max(pool)
    return c, _round_up(n, c)


def dqfm_loss_pallas(C12_m, C21_m, C12_p, C21_p,
                     feat1_m, feat2_m, feat1_p, feat2_p,
                     T1, T2, V1, V2,
                     w_cos=1.0, w_res=1.0, w_ortho=1.0, w_cross=1.0,
                     stream_dtype=jnp.bfloat16):
    B, K, _ = C12_p.shape
    N1, D1 = feat1_m.shape[1], feat1_m.shape[2]
    N2, D2 = feat2_m.shape[1], feat2_m.shape[2]
    Dv1, Dv2 = V1.shape[2], V2.shape[2]
    N = T1.shape[1]

    # TODO(synk): support T1/T2 with different vertex counts (separate row-tile grids).
    assert T1.shape[1] == T1.shape[2] == V1.shape[1]
    assert T2.shape[1] == T2.shape[2] == V2.shape[1]
    assert T1.shape[1] == T2.shape[1]

    # ---------------- generation-aware VMEM budgets ----------------
    vmem_cap = min(max(_vmem_capacity_bytes(), 32 << 20), 128 << 20)
    vmem_limit_cap = int(vmem_cap * 0.78)     # ~50 MiB on v7x, ~100 MiB on v5e/v6e
    bpe = int(np.dtype(stream_dtype).itemsize)

    v_res_est = 2 * _round_up(N, 8) * (Dv1 + Dv2) * bpe       # V residents (dbl-buf)
    tile_budget = max(vmem_limit_cap - v_res_est - (4 << 20), 8 << 20)

    TN, Np = _pick_row_tile(N, tile_budget, bpe)
    NT = Np // TN
    pad = Np - N

    # zero-pad T (rows+cols) and V (rows): padded rows/cols contribute 0 to ||TV-V||^2
    def _pad_T(T):
        return jnp.pad(T, ((0, 0), (0, pad), (0, pad))) if pad else T

    def _pad_V(V):
        return jnp.pad(V, ((0, 0), (0, pad), (0, 0))) if pad else V

    T1s = _pad_T(T1).astype(stream_dtype)
    T2s = _pad_T(T2).astype(stream_dtype)
    V1s = _pad_V(V1).astype(stream_dtype)
    V2s = _pad_V(V2).astype(stream_dtype)

    # v7x has 2 TensorCores: add a second parallel axis when B alone is too small/odd
    P = 2 if (NT % 2 == 0 and NT >= 2 and (B % 2 == 1 or B < 4)) else 1
    NTp = NT // P

    est1 = (2 * 2 * TN * Np * bpe              # T1, T2 tiles, double-buffered
            + 2 * Np * (Dv1 + Dv2) * bpe       # V1, V2 residents, double-buffered
            + 2 * _OUT_LANES * 4 + (2 << 20))  # output block + headroom
    vmem1 = int(min(vmem_limit_cap, max(est1, 16 << 20)))

    cross_out = pl.pallas_call(
        _cross_kernel,
        out_shape=jax.ShapeDtypeStruct((B, P, _OUT_LANES), jnp.float32),
        grid_spec=pltpu.PrefetchScalarGridSpec(
            num_scalar_prefetch=0,
            grid=(B, P, NTp),
            in_specs=[
                pl.BlockSpec((1, TN, Np), lambda b, p, t: (b, p * NTp + t, 0)),
                pl.BlockSpec((1, TN, Np), lambda b, p, t: (b, p * NTp + t, 0)),
                pl.BlockSpec((1, Np, Dv1), lambda b, p, t: (b, 0, 0)),
                pl.BlockSpec((1, Np, Dv2), lambda b, p, t: (b, 0, 0)),
            ],
            out_specs=pl.BlockSpec((1, 1, _OUT_LANES), lambda b, p, t: (b, p, 0)),
        ),
        compiler_params=pltpu.CompilerParams(
            dimension_semantics=("parallel", "parallel", "arbitrary"),
            vmem_limit_bytes=vmem1,
        ),
    )(T1s, T2s, V1s, V2s)

    # ------------- second (tiny) call: cosine / res / ortho / bij -------------
    KK = K * K
    cres_m = jnp.concatenate([C12_m.reshape(B, 1, KK), C21_m.reshape(B, 1, KK)], axis=2)
    cres_p = jnp.concatenate([C12_p.reshape(B, 1, KK), C21_p.reshape(B, 1, KK)], axis=2)
    crows_p = jnp.concatenate([C12_p, C21_p], axis=1)            # (B, 2K, K)
    ccols_p = jnp.concatenate([C21_p, C12_p], axis=2)            # (B, K, 2K)
    f1m = jnp.swapaxes(feat1_m, 1, 2)                            # (B, D, N) lane-dense
    f1p = jnp.swapaxes(feat1_p, 1, 2)
    f2m = jnp.swapaxes(feat2_m, 1, 2)
    f2p = jnp.swapaxes(feat2_p, 1, 2)

    # TODO(synk): row-tile the feature tensors along N if D*N ever outgrows VMEM.
    est2 = int(2 * (2 * D1 * N1 + 2 * D2 * N2) * 4
               + 2 * 8 * KK * 4
               + 2 * _OUT_LANES * 4 + (2 << 20))
    vmem2 = int(min(vmem_limit_cap, max(est2, 16 << 20)))

    terms_out = pl.pallas_call(
        _terms_kernel,
        out_shape=jax.ShapeDtypeStruct((B, 1, _OUT_LANES), jnp.float32),
        grid_spec=pltpu.PrefetchScalarGridSpec(
            num_scalar_prefetch=0,
            grid=(B,),
            in_specs=[
                pl.BlockSpec((1, 1, 2 * KK), lambda b: (b, 0, 0)),
                pl.BlockSpec((1, 1, 2 * KK), lambda b: (b, 0, 0)),
                pl.BlockSpec((1, 2 * K, K), lambda b: (b, 0, 0)),
                pl.BlockSpec((1, K, 2 * K), lambda b: (b, 0, 0)),
                pl.BlockSpec((1, D1, N1), lambda b: (b, 0, 0)),
                pl.BlockSpec((1, D1, N1), lambda b: (b, 0, 0)),
                pl.BlockSpec((1, D2, N2), lambda b: (b, 0, 0)),
                pl.BlockSpec((1, D2, N2), lambda b: (b, 0, 0)),
            ],
            out_specs=pl.BlockSpec((1, 1, _OUT_LANES), lambda b: (b, 0, 0)),
        ),
        compiler_params=pltpu.CompilerParams(
            dimension_semantics=("parallel",),
            vmem_limit_bytes=vmem2,
        ),
    )(cres_m, cres_p, crows_p, ccols_p, f1m, f1p, f2m, f2p)

    # ----------------------- final scalar glue (plain JAX) -----------------------
    cross_s = jnp.sum(cross_out[:, :, 0])
    terms = jnp.sum(terms_out[:, 0, :], axis=0)     # (LANES,), summed over batch
    cos1_s, cos2_s, res_s, ortho_s, bij_s = (terms[0], terms[1], terms[2],
                                             terms[3], terms[4])

    cos_loss = w_cos * (1.0 - (cos1_s / (B * N1) + cos2_s / (B * N2)) / 2.0)
    res_loss = w_res * (res_s / B) / 2.0
    ortho_loss = w_ortho * (ortho_s / B) / 2.0
    cross_loss = w_cross * (cross_s / B) / 2.0
    bij_loss = w_ortho * (bij_s / B) / 2.0
    loss = cos_loss + res_loss + ortho_loss + cross_loss + bij_loss
    return [loss, cos_loss, res_loss, ortho_loss, cross_loss, bij_loss]


# ---------------------- pure-JAX reference (for sanity check) ----------------------
def _frob_ref(a, b):
    return jnp.mean(jnp.sum(jnp.abs(a - b) ** 2, axis=(1, 2)))


def _cos_sim_ref(a, b, eps=EPS):
    dot = jnp.sum(a * b, axis=2)
    na = jnp.sqrt(jnp.sum(a * a, axis=2))
    nb = jnp.sqrt(jnp.sum(b * b, axis=2))
    return dot / jnp.maximum(na * nb, eps)


def dqfm_loss_ref(C12_m, C21_m, C12_p, C21_p,
                  feat1_m, feat2_m, feat1_p, feat2_p,
                  T1, T2, V1, V2,
                  w_cos=1.0, w_res=1.0, w_ortho=1.0, w_cross=1.0):
    cos_loss = w_cos * (1.0 - (jnp.mean(_cos_sim_ref(feat1_m, feat1_p))
                               + jnp.mean(_cos_sim_ref(feat2_m, feat2_p))) / 2.0)
    res_loss = w_res * (_frob_ref(C12_m, C12_p) + _frob_ref(C21_m, C21_p)) / 2.0
    K = C12_p.shape[1]
    I = jnp.eye(K)[None]
    CCt12 = C12_p @ jnp.swapaxes(C12_p, 1, 2)
    CCt21 = C21_p @ jnp.swapaxes(C21_p, 1, 2)
    ortho_loss = w_ortho * (_frob_ref(CCt12, I) + _frob_ref(CCt21, I)) / 2.0
    V1_pre = jnp.einsum('bij,bjk->bik', T1, V1)
    V2_pre = jnp.einsum('bij,bjk->bik', T2, V2)
    cross_loss = w_cross * (_frob_ref(V1_pre, V1) + _frob_ref(V2_pre, V2)) / 2.0
    bij_loss = w_ortho * (_frob_ref(jnp.einsum('bij,bjk->bik', C12_p, C21_p), I)
                          + _frob_ref(jnp.einsum('bij,bjk->bik', C21_p, C12_p), I)) / 2.0
    loss = cos_loss + res_loss + ortho_loss + cross_loss + bij_loss
    return [loss, cos_loss, res_loss, ortho_loss, cross_loss, bij_loss]


if __name__ == "__main__":
    B, K, N, D, Dv = 2, 16, 32, 16, 8
    key = jax.random.PRNGKey(0)
    ks = jax.random.split(key, 12)

    C12_m = jax.random.normal(ks[0], (B, K, K), jnp.float32)
    C21_m = jax.random.normal(ks[1], (B, K, K), jnp.float32)
    C12_p = jax.random.normal(ks[2], (B, K, K), jnp.float32)
    C21_p = jax.random.normal(ks[3], (B, K, K), jnp.float32)
    feat1_m = jax.random.normal(ks[4], (B, N, D), jnp.float32)
    feat2_m = jax.random.normal(ks[5], (B, N, D), jnp.float32)
    feat1_p = jax.random.normal(ks[6], (B, N, D), jnp.float32)
    feat2_p = jax.random.normal(ks[7], (B, N, D), jnp.float32)
    T1 = jax.random.normal(ks[8], (B, N, N), jnp.float32)
    T2 = jax.random.normal(ks[9], (B, N, N), jnp.float32)
    V1 = jax.random.normal(ks[10], (B, N, Dv), jnp.float32)
    V2 = jax.random.normal(ks[11], (B, N, Dv), jnp.float32)

    args = (C12_m, C21_m, C12_p, C21_p,
            feat1_m, feat2_m, feat1_p, feat2_p, T1, T2, V1, V2)

    out = dqfm_loss_pallas(*args)
    out = jax.block_until_ready(out)

    # The kernel streams T/V in bf16 (the dominant HBM traffic); compare against a
    # reference computed on the same bf16-rounded T/V so the check is apples-to-apples.
    def _rt(x):
        return x.astype(jnp.bfloat16).astype(jnp.float32)

    ref = dqfm_loss_ref(C12_m, C21_m, C12_p, C21_p,
                        feat1_m, feat2_m, feat1_p, feat2_p,
                        _rt(T1), _rt(T2), _rt(V1), _rt(V2))
    for got, exp in zip(out, ref):
        np.testing.assert_allclose(np.asarray(got), np.asarray(exp),
                                   rtol=1e-4, atol=1e-4)

    print("KERNEL_OK")
</pallas_src>

<mosaic_0001>
module attributes {stable_mosaic.version = 11 : i64} {
  func.func @_cross_kernel(%arg0: i32, %arg1: i32, %arg2: i32, %arg3: memref<1x32x32xbf16, #tpu.memory_space<vmem>>, %arg4: memref<1x32x32xbf16, #tpu.memory_space<vmem>>, %arg5: memref<1x32x8xbf16, #tpu.memory_space<vmem>>, %arg6: memref<1x32x8xbf16, #tpu.memory_space<vmem>>, %arg7: memref<1x1x128xf32, #tpu.memory_space<vmem>>) attributes {dimension_semantics = [#tpu.dimension_semantics<parallel>, #tpu.dimension_semantics<parallel>, #tpu.dimension_semantics<arbitrary>], iteration_bounds = array<i64: 2, 1, 1>, scalar_prefetch = 0 : i64, scratch_operands = 0 : i64, tpu.core_type = #tpu.core_type<tc>, window_params = [{transform_indices = @transform_0, window_bounds = array<i64: 1, 32, 32>}, {transform_indices = @transform_1, window_bounds = array<i64: 1, 32, 32>}, {transform_indices = @transform_2, window_bounds = array<i64: 1, 32, 8>}, {transform_indices = @transform_3, window_bounds = array<i64: 1, 32, 8>}, {transform_indices = @transform_4, window_bounds = array<i64: 1, 1, 128>}]} {
    %c0 = arith.constant 0 : index
    %c0_0 = arith.constant 0 : index
    %c0_1 = arith.constant 0 : index
    %0 = vector.load %arg3[%c0, %c0_0, %c0_1] : memref<1x32x32xbf16, #tpu.memory_space<vmem>>, vector<1x32x32xbf16>
    %1 = vector.shape_cast %0 : vector<1x32x32xbf16> to vector<32x32xbf16>
    %c0_2 = arith.constant 0 : index
    %c0_3 = arith.constant 0 : index
    %c0_4 = arith.constant 0 : index
    %2 = vector.load %arg4[%c0_2, %c0_3, %c0_4] : memref<1x32x32xbf16, #tpu.memory_space<vmem>>, vector<1x32x32xbf16>
    %3 = vector.shape_cast %2 : vector<1x32x32xbf16> to vector<32x32xbf16>
    %c0_5 = arith.constant 0 : index
    %c0_6 = arith.constant 0 : index
    %c0_7 = arith.constant 0 : index
    %4 = vector.load %arg5[%c0_5, %c0_6, %c0_7] : memref<1x32x8xbf16, #tpu.memory_space<vmem>>, vector<1x32x8xbf16>
    %5 = vector.shape_cast %4 : vector<1x32x8xbf16> to vector<32x8xbf16>
    %c0_8 = arith.constant 0 : index
    %c0_9 = arith.constant 0 : index
    %c0_10 = arith.constant 0 : index
    %6 = vector.load %arg6[%c0_8, %c0_9, %c0_10] : memref<1x32x8xbf16, #tpu.memory_space<vmem>>, vector<1x32x8xbf16>
    %7 = vector.shape_cast %6 : vector<1x32x8xbf16> to vector<32x8xbf16>
    %cst = arith.constant dense<0.000000e+00> : vector<32x8xf32>
    %8 = tpu.matmul %1, %5, %cst {dimension_numbers = #tpu.dot_dimension_numbers<[1], [0], [0], [1], [0, 0, 1, 1], [], []>} : vector<32x32xbf16>, vector<32x8xbf16>, vector<32x8xf32> -> vector<32x8xf32>
    %cst_11 = arith.constant dense<0.000000e+00> : vector<32x8xf32>
    %9 = tpu.matmul %3, %7, %cst_11 {dimension_numbers = #tpu.dot_dimension_numbers<[1], [0], [0], [1], [0, 0, 1, 1], [], []>} : vector<32x32xbf16>, vector<32x8xbf16>, vector<32x8xf32> -> vector<32x8xf32>
    %c1_i32 = arith.constant 1 : i32
    %10 = arith.muli %arg1, %c1_i32 : i32
    %11 = arith.addi %10, %arg2 : i32
    %c32_i32 = arith.constant 32 : i32
    %12 = arith.muli %11, %c32_i32 : i32
    %13 = tpu.assume_multiple %12, 8 : i32
    %c0_12 = arith.constant 0 : index
    %14 = arith.index_cast %13 : i32 to index
    %c0_13 = arith.constant 0 : index
    %15 = vector.load %arg5[%c0_12, %14, %c0_13] : memref<1x32x8xbf16, #tpu.memory_space<vmem>>, vector<1x32x8xbf16>
    %16 = vector.shape_cast %15 : vector<1x32x8xbf16> to vector<32x8xbf16>
    %17 = arith.extf %16 : vector<32x8xbf16> to vector<32x8xf32>
    %c0_14 = arith.constant 0 : index
    %18 = arith.index_cast %13 : i32 to index
    %c0_15 = arith.constant 0 : index
    %19 = vector.load %arg6[%c0_14, %18, %c0_15] : memref<1x32x8xbf16, #tpu.memory_space<vmem>>, vector<1x32x8xbf16>
    %20 = vector.shape_cast %19 : vector<1x32x8xbf16> to vector<32x8xbf16>
    %21 = arith.extf %20 : vector<32x8xbf16> to vector<32x8xf32>
    %22 = arith.subf %8, %17 : vector<32x8xf32>
    %23 = arith.subf %9, %21 : vector<32x8xf32>
    %24 = arith.mulf %22, %22 : vector<32x8xf32>
    %cst_16 = arith.constant dense<0.000000e+00> : vector<32xf32>
    %25 = vector.multi_reduction <add>, %24, %cst_16 [1] : vector<32x8xf32> to vector<32xf32>
    %26 = vector.shape_cast %25 : vector<32xf32> to vector<32x1xf32>
    %cst_17 = arith.constant dense<0.000000e+00> : vector<1xf32>
    %27 = vector.multi_reduction <add>, %26, %cst_17 [0] : vector<32x1xf32> to vector<1xf32>
    %28 = vector.shape_cast %27 : vector<1xf32> to vector<1x1xf32>
    %29 = arith.mulf %23, %23 : vector<32x8xf32>
    %cst_18 = arith.constant dense<0.000000e+00> : vector<32xf32>
    %30 = vector.multi_reduction <add>, %29, %cst_18 [1] : vector<32x8xf32> to vector<32xf32>
    %31 = vector.shape_cast %30 : vector<32xf32> to vector<32x1xf32>
    %cst_19 = arith.constant dense<0.000000e+00> : vector<1xf32>
    %32 = vector.multi_reduction <add>, %31, %cst_19 [0] : vector<32x1xf32> to vector<1xf32>
    %33 = vector.shape_cast %32 : vector<1xf32> to vector<1x1xf32>
    %34 = arith.addf %28, %33 : vector<1x1xf32>
    %35 = vector.shape_cast %34 : vector<1x1xf32> to vector<1x1x1xf32>
    %36 = vector.shape_cast %35 : vector<1x1x1xf32> to vector<1x1x1xf32>
    %37 = vector.broadcast %36 : vector<1x1x1xf32> to vector<1x1x128xf32>
    %c0_i32 = arith.constant 0 : i32
    %38 = arith.cmpi eq, %arg2, %c0_i32 : i32
    %39 = arith.extui %38 : i1 to i32
    %c0_i32_20 = arith.constant 0 : i32
    %40 = arith.cmpi ne, %39, %c0_i32_20 : i32
    scf.if %40 {
      %c0_23 = arith.constant 0 : index
      %c0_24 = arith.constant 0 : index
      %c0_25 = arith.constant 0 : index
      %44 = vector.load %arg7[%c0_23, %c0_24, %c0_25] : memref<1x1x128xf32, #tpu.memory_space<vmem>>, vector<1x1x128xf32>
      tpu.vector_store %arg7[%c0_23, %c0_24, %c0_25], %37 {strides = array<i32>} : memref<1x1x128xf32, #tpu.memory_space<vmem>>, vector<1x1x128xf32>,
    } else {
    }
    %c0_i32_21 = arith.constant 0 : i32
    %41 = arith.cmpi sgt, %arg2, %c0_i32_21 : i32
    %42 = arith.extui %41 : i1 to i32
    %c0_i32_22 = arith.constant 0 : i32
    %43 = arith.cmpi ne, %42, %c0_i32_22 : i32
    scf.if %43 {
      %c0_23 = arith.constant 0 : index
      %c0_24 = arith.constant 0 : index
      %c0_25 = arith.constant 0 : index
      %44 = vector.load %arg7[%c0_23, %c0_24, %c0_25] : memref<1x1x128xf32, #tpu.memory_space<vmem>>, vector<1x1x128xf32>
      %45 = arith.addf %44, %37 : vector<1x1x128xf32>
      %c0_26 = arith.constant 0 : index
      %c0_27 = arith.constant 0 : index
      %c0_28 = arith.constant 0 : index
      %46 = vector.load %arg7[%c0_26, %c0_27, %c0_28] : memref<1x1x128xf32, #tpu.memory_space<vmem>>, vector<1x1x128xf32>
      tpu.vector_store %arg7[%c0_26, %c0_27, %c0_28], %45 {strides = array<i32>} : memref<1x1x128xf32, #tpu.memory_space<vmem>>, vector<1x1x128xf32>,
    } else {
    }
    return
  }
  func.func @transform_0(%arg0: i32, %arg1: i32, %arg2: i32) -> (i32, i32, i32) {
    %c1_i32 = arith.constant 1 : i32
    %0 = arith.muli %arg1, %c1_i32 : i32
    %1 = arith.addi %0, %arg2 : i32
    %c0_i32 = arith.constant 0 : i32
    %c0_i32_0 = arith.constant 0 : i32
    return %arg0, %1, %c0_i32 : i32, i32, i32
  }
  func.func @transform_1(%arg0: i32, %arg1: i32, %arg2: i32) -> (i32, i32, i32) {
    %c1_i32 = arith.constant 1 : i32
    %0 = arith.muli %arg1, %c1_i32 : i32
    %1 = arith.addi %0, %arg2 : i32
    %c0_i32 = arith.constant 0 : i32
    %c0_i32_0 = arith.constant 0 : i32
    return %arg0, %1, %c0_i32 : i32, i32, i32
  }
  func.func @transform_2(%arg0: i32, %arg1: i32, %arg2: i32) -> (i32, i32, i32) {
    %c0_i32 = arith.constant 0 : i32
    %c0_i32_0 = arith.constant 0 : i32
    %c0_i32_1 = arith.constant 0 : i32
    return %arg0, %c0_i32, %c0_i32_0 : i32, i32, i32
  }
  func.func @transform_3(%arg0: i32, %arg1: i32, %arg2: i32) -> (i32, i32, i32) {
    %c0_i32 = arith.constant 0 : i32
    %c0_i32_0 = arith.constant 0 : i32
    %c0_i32_1 = arith.constant 0 : i32
    return %arg0, %c0_i32, %c0_i32_0 : i32, i32, i32
  }
  func.func @transform_4(%arg0: i32, %arg1: i32, %arg2: i32) -> (i32, i32, i32) {
    %c0_i32 = arith.constant 0 : i32
    %c0_i32_0 = arith.constant 0 : i32
    return %arg0, %arg1, %c0_i32 : i32, i32, i32
  }
}

</mosaic_0001>

<bundles_post_ra>
// kernel: tpu_custom_call.1
= control target key start
LH: loop header
LB: loop body
LE: loop exit
PB: predicated region body
PF: predicated region fallthrough
CT: control target
= control target key end

     0   :  { %9 = vsyncpa [#allocation3], 0  ;;  %s1095_s0 = inlined_call_operand.vmem [shape: bf16[2,32,32], index: 0, kind: input, shape index: {}]   ;;  %s1096_s1 = inlined_call_operand.vmem [shape: bf16[2,32,32], index: 1, kind: input, shape index: {}]   ;;  %s1097_s2 = inlined_call_operand.vmem [shape: bf16[2,32,8], index: 2, kind: input, shape index: {}]   ;;  %s1098_s3 = inlined_call_operand.vmem [shape: bf16[2,32,8], index: 3, kind: input, shape index: {}]   ;;  %s1099_s4 = inlined_call_operand.hbm [shape: f32[2,1,128], index: 4, kind: output, shape index: {}]  }
   0x1   :  { %11 = vsyncpa [#allocation3 + $0x1], 0  ;;  %s966_s15 = smov 0   ;;  %s968_s16 = smov 0  }
   0x2   :  { %s970_s17 = smov 0   ;;  %s972_s18 = smov 0  }
   0x3   :  { %s974_s19 = smov 0   ;;  %s976_s20 = smov 0  }
   0x4 LB: > { %s723_s21 = sadd.s32 4294967295, %s938_s20   ;;  %s724_s22 = sadd.s32 4294967294, %s938_s20   ;;  %s938_s20 = sphi %s976_s20, %s17_s20   ;;  %s934_s19 = sphi %s974_s19, %s1106_s19   ;;  %s930_s18 = sphi %s972_s18, %s1105_s18   ;;  %s926_s17 = sphi %s970_s17, %s1104_s17   ;;  %s922_s16 = sphi %s968_s16, %s1103_s16   ;;  %s918_s15 = sphi %s966_s15, %s1102_s15  }
   0x5   : > { %s36_s23 = sadd.s32 1, %s934_s19  ;;  %s157_s24 = sadd.s32 1, %s926_s17 }
   0x6   : > { %p38_p0 = scmp.ge.s32.totalorder %s36_s23, 2  ;;  %p167_p1 = scmp.ne.s32.totalorder %s926_s17, %s922_s16 }
   0x7   : > { %p168_p2 = scmp.eq.s32.totalorder %s723_s21, 1  ;;  %p173_p3 = scmp.ne.s32.totalorder %s922_s16, %s918_s15 }
   0x8   : > { %s1108_s23 = smov (%p38_p0, %s36_s23), 0  ;;  %p174_p5 = scmp.eq.s32.totalorder %s724_s22, 1 }
   0x9   : > { %p1006_p4 = por %p168_p2, %p167_p1  ;;  %s152_s26 = ssub.s32 %s934_s19, %s1108_s23 }
   0xa   : > { %p727_p6 = scmp.ge.s32.totalorder %s938_s20, 1  ;;  %p155_p7 = scmp.eq.s32.totalorder %s152_s26, 0 }
   0xb   : > { %p1013_p8 = por %p174_p5, %p173_p3  ;;  %p238_p9 = scmp.lt.s32.totalorder %s938_s20, 3 }
   0xc   : > { %s1019_s28 = scalar_select %p155_p7, %s926_s17, %s157_s24  }
   0xd   : > { %p239_p10 = pnand %p727_p6, %p238_p9 }
   0xe   : > { %p290_p11 = scmp.lt.s32.totalorder (!%p239_p10), %s930_s18, 1  ;;  %vm361_vm0 = vcmask (!%p239_p10), 261120   ;;  %vm530_vm1 = vcmask (!%p239_p10), 64512   ;;  %s286_s24 = sand.u32 (!%p239_p10), 1, %s922_s16  }
   0xf   : > { %242 = sbr.rel (%p239_p10) target bundleno = 437 (0x1b5), region = 36  ;;  %s748_s26 = sshll.u32 (!%p239_p10), %s930_s18, 4 }
  0x10   : > { %s591_s8 = scalar_lea.sflag (!%p239_p10), [#allocation3], %s286_s24 }
  0x16   : > { %s291_s29 = scalar_select %p290_p11, %s930_s18, 1 }
  0x17   : > { %s940_s18 = smov [#allocation2]  }
  0x18   : > { %s751_s30 = sshll.u32 %s291_s29, 4  ;;  %s287_s29 = scalar_lea.vmem [#allocation2], %s286_s24 }
  0x19   : > { %s316_s7 = scalar_lea.vmem %s1097_s2, %s751_s30  ;;  %s321_s10 = scalar_lea.vmem %s1098_s3, %s751_s30 }
  0x1a   : > { %v852_v0 = vld [vmem:[%s316_s7] sm:$0xff]   ;;  %s297_s13 = scalar_lea.vmem %s1095_s0, %s751_s30  ;;  %v854_v2 = vld [vmem:[%s316_s7 + $0x8] sm:$0xff]   ;;  %s309_s22 = scalar_lea.vmem %s1096_s1, %s751_s30 }
  0x1b   : > { %v853_v1 = vld [vmem:[%s321_s10] sm:$0xff]   ;;  %781 = vmatprep.subr.bf16.mxu0 %v852_v0  ;;  %v855_v3 = vld [vmem:[%s321_s10 + $0x8] sm:$0xff]   ;;  %s604_s30 = sshll.u32 %s287_s29, 4  ;;  %s1050_s30 = int_to_ptr.vmem [resolvable:$true] %s604_s30 }
  0x1c   : > { %789 = vmatprep.subr.bf16.mxu1 %v853_v1  ;;  %782 = vmatpush3.bf16.msra.mxu0 %v852_v0  ;;  %v856_v4 = vld [vmem:[%s297_s13] sm:$0xff]   ;;  %v858_v6 = vld [vmem:[%s297_s13 + $0x8] sm:$0xff]   ;;  %s860_s9 = scalar_lea.vmem %s1050_s30, 16 }
  0x1d   : > { %790 = vmatpush3.bf16.msra.mxu1 %v853_v1  ;;  %783 = vmatprep.subr.bf16.mxu0 %v854_v2  ;;  %v857_v5 = vld [vmem:[%s309_s22] sm:$0xff]   ;;  %v859_v7 = vld [vmem:[%s309_s22 + $0x8] sm:$0xff]   ;;  %p861_p12 = scmp.ne.s32.totalorder %s1050_s30, %s860_s9 }
  0x1e   : > { %791 = vmatprep.subr.bf16.mxu1 %v855_v3  ;;  %785 = vmatprep.mubr.msk.bf16.mxu0 %vm361_vm0, %v856_v4  ;;  %v771_v8 = vld [vmem:[%s316_s7 + $0x8] sm:$0xff]   ;;  %v756_v10 = vld [vmem:[%s316_s7] sm:$0xff]   ;;  %s1048_s7 = scalar_lea.hbm %s1099_s4, %s748_s26 }
  0x1f   : > { %793 = vmatprep.mubr.msk.bf16.mxu1 %vm361_vm0, %v857_v5  ;;  %v772_v9 = vld [vmem:[%s321_s10 + $0x8] sm:$0xff]   ;;  %v764_v11 = vld [vmem:[%s321_s10] sm:$0xff]   ;;  %v761_v12 = vunpack.c.l.bf16 %v771_v8  ;;  %v757_v14 = vunpack.c.l.bf16 %v756_v10  ;;  %v758_v20 = vunpack.c.h.bf16 %v756_v10  ;;  %v762_v33 = vunpack.c.h.bf16 %v771_v8  ;;  %p862_p13 = pnand %p861_p12, %p1006_p4  ;;  %s864_s10 = sshll.u32 %s940_s18, 4  ;;  %s865_s10 = int_to_ptr.vmem [resolvable:$false] %s864_s10 }
  0x20   : > { %784 = vmatpush3.bf16.msra.mxu0 %v854_v2  ;;  %v769_v13 = vunpack.c.l.bf16 %v772_v9  ;;  %v765_v15 = vunpack.c.l.bf16 %v764_v11  ;;  %v766_v25 = vunpack.c.h.bf16 %v764_v11  ;;  %v770_v37 = vunpack.c.h.bf16 %v772_v9  ;;  %s866_s11 = scalar_lea.vmem %s865_s10, 32  ;;  %p867_p1 = scmp.lt.s32.totalorder %s1050_s30, %s865_s10 }
  0x21   : > { %792 = vmatpush3.bf16.msra.mxu1 %v855_v3  ;;  %p863_p0 = pneg %p862_p13  ;;  %p868_p2 = scmp.lt.s32.totalorder %s866_s11, %s860_s9 }
  0x23   : > { %786 = vmatmul.mubr.msk.bf16.vlgmr.msra.gmra.mrb[0].mxu0 %vm361_vm0, %v858_v6  ;;  %p869_p3 = por %p868_p2, %p867_p1 }
  0x24   : > { %794 = vmatmul.mubr.msk.bf16.vlgmr.msra.gmra.mrb[0].mxu1 %vm361_vm0, %v859_v7 }
  0x25   : > { %p870_p5 = pnand %p869_p3, %p863_p0 }
  0xf6   : > { %v787_v16 = vpop.f32.mrb[0].mxu0 }
  0xf7   : > { %v520_v17 = vsub.f32 %v787_v16, %v761_v12  ;;  %v795_v18 = vpop.f32.mrb[0].mxu1  ;;  %v402_v19 = vpop.f32.mrb[1].mxu0 }
  0xf8   : > { %v524_v21 = vsub.f32 %v795_v18, %v769_v13  ;;  %v518_v22 = vsub.f32 %v402_v19, %v757_v14  ;;  %v479_v23 = vpop.f32.mrb[1].mxu1  ;;  %v788_v24 = vpop.f32.mrb[2].mxu0 }
  0xf9   : > { %v528_v26 = vmul.f32 %v520_v17, %v520_v17  ;;  %v522_v27 = vsub.f32 %v479_v23, %v765_v15  ;;  %v796_v28 = vpop.f32.mrb[2].mxu1  ;;  %v405_v29 = vpop.f32.mrb[3].mxu0  ;;  %v521_v40 = vsub.f32 %v788_v24, %v762_v33 }
  0xfa   : > { %v554_v30 = vmul.f32 %v524_v21, %v524_v21  ;;  %v482_v31 = vpop.f32.mrb[3].mxu1  ;;  %v526_v32 = vmul.f32 %v518_v22, %v518_v22  ;;  %v519_v34 = vsub.f32 %v405_v29, %v758_v20  ;;  %v525_v43 = vsub.f32 %v796_v28, %v770_v37 }
  0xfb   : > { %v537_v35 = vsel %vm530_vm1, %v528_v26, 0.0  ;;  %v552_v36 = vmul.f32 %v522_v27, %v522_v27  ;;  %v523_v38 = vsub.f32 %v482_v31, %v766_v25  ;;  %v529_v46 = vmul.f32 %v521_v40, %v521_v40 }
  0xfc   : > { %v562_v39 = vsel %vm530_vm1, %v554_v30, 0.0  ;;  %538 = vadd.xlane.f32.xlu0 %v537_v35  ;;  %v527_v41 = vmul.f32 %v519_v34, %v519_v34  ;;  %v531_v42 = vsel %vm530_vm1, %v526_v32, 0.0  ;;  %v555_v48 = vmul.f32 %v525_v43, %v525_v43 }
  0xfd   : > { %563 = vadd.xlane.f32.xlu1 %v562_v39  ;;  %v553_v44 = vmul.f32 %v523_v38, %v523_v38  ;;  %v556_v45 = vsel %vm530_vm1, %v552_v36, 0.0  ;;  %v540_v50 = vsel %vm530_vm1, %v529_v46, 0.0 }
  0xfe   : > { %v534_v47 = vsel %vm530_vm1, %v527_v41, 0.0  ;;  %v565_v51 = vsel %vm530_vm1, %v555_v48, 0.0 }
  0xff   : > { %v559_v49 = vsel %vm530_vm1, %v553_v44, 0.0 }
 0x100   : > { %532 = vadd.xlane.f32.xlu0 %v531_v42 }
 0x101   : > { %557 = vadd.xlane.f32.xlu1 %v556_v45 }
 0x104   : > { %535 = vadd.xlane.f32.xlu0 %v534_v47 }
 0x105   : > { %560 = vadd.xlane.f32.xlu1 %v559_v49 }
 0x108   : > { %541 = vadd.xlane.f32.xlu0 %v540_v50 }
 0x109   : > { %566 = vadd.xlane.f32.xlu1 %v565_v51 }
 0x189   : > { %v539_v52 = vpop.xlane.xlu0 %538 }
 0x18a   : > { %v564_v53 = vpop.xlane.xlu1 %563 }
 0x18d   : > { %v533_v54 = vpop.xlane.xlu0 %532 }
 0x18e   : > { %v558_v55 = vpop.xlane.xlu1 %557 }
 0x191   : > { %v536_v56 = vpop.xlane.xlu0 %535 }
 0x192   : > { %v561_v57 = vpop.xlane.xlu1 %560  ;;  %v543_v58 = vadd.f32 %v536_v56, %v533_v54 }
 0x193   : > { %v568_v59 = vadd.f32 %v561_v57, %v558_v55 }
 0x194   : > { %v544_v60 = vadd.f32 %v543_v58, %v539_v52 }
 0x195   : > { %v569_v61 = vadd.f32 %v568_v59, %v564_v53  ;;  %v542_v62 = vpop.xlane.xlu0 %541 }
 0x196   : > { %v567_v63 = vpop.xlane.xlu1 %566  ;;  %v545_v0 = vadd.f32 %v544_v60, %v542_v62 }
 0x197   : > { %v570_v1 = vadd.f32 %v569_v61, %v567_v63 }
 0x198   : > { %v546_v2 = vrot.slane %v545_v0, 4 }
 0x199   : > { %v571_v3 = vrot.slane %v570_v1, 4 }
 0x19a   : > { %v547_v4 = vadd.f32 %v546_v2, %v545_v0 }
 0x19b   : > { %v572_v5 = vadd.f32 %v571_v3, %v570_v1 }
 0x19c   : > { %v548_v6 = vrot.slane %v547_v4, 2 }
 0x19d   : > { %v573_v7 = vrot.slane %v572_v5, 2 }
 0x19e   : > { %v549_v8 = vadd.f32 %v548_v6, %v547_v4 }
 0x19f   : > { %v574_v9 = vadd.f32 %v573_v7, %v572_v5 }
 0x1a0   : > { %v550_v10 = vrot.slane %v549_v8, 1 }
 0x1a1   : > { %v575_v11 = vrot.slane %v574_v9, 1 }
 0x1a2   : > { %v551_v12 = vadd.f32 %v550_v10, %v549_v8 }
 0x1a3   : > { %v576_v13 = vadd.f32 %v575_v11, %v574_v9 }
 0x1a5   : > { %v577_v14 = vadd.f32 %v576_v13, %v551_v12 }
 0x1a7   : > { %582 = vst [vmem:[%s287_s29] sm:$0x1] %v577_v14 }
 0x1a8   : > { %873 = shalt.err (!%p870_p5)
}
 0x1a9   : > { %s874_s12 = scalar_lea.hbm %s1048_s7, 16  ;;  %s878_s21 = scalar_lea.hbm %s1099_s4, 32 }
 0x1aa   : > { %p875_p6 = scmp.ne.s32.totalorder %s1048_s7, %s874_s12  ;;  %p879_p10 = scmp.lt.u32.totalorder %s1048_s7, %s1099_s4 }
 0x1ab   : > { %p880_p11 = scmp.lt.u32.totalorder %s878_s21, %s874_s12  ;;  %p882_p13 = scmp.lt.u32.totalorder %s874_s12, %s1048_s7 }
 0x1ac   : > { %p876_p7 = pnand %p875_p6, %p1006_p4 }
 0x1ad   : > { %p881_p12 = por %p880_p11, %p879_p10 }
 0x1ae   : > { %p877_p9 = pneg %p876_p7 }
 0x1af   : > { %p883_p0 = por %p882_p13, %p881_p12 }
 0x1b1   : > { %p884_p1 = pnand %p883_p0, %p877_p9 }
 0x1b3   : > { %887 = shalt.err (!%p884_p1)
}
 0x1b4   : > { %797 = dma.vmem_to_hbm [thread:$0]  (%p1006_p4), %s1050_s30, 16, %s1048_s7, %s591_s8  }
 0x1b5 PF: > { %p803_p2 = scmp.ge.s32.totalorder %s938_s20, 2  ;;  %s616_s26 = sand.u32 1, %s918_s15  }
 0x1b6   : > { %s617_s29 = scalar_lea.sflag [#allocation3], %s616_s26 }
 0x1b7   : > { %p800_p3 = pnand %p803_p2, %p1013_p8 }
 0x1b9   : > { %913 = dma.done.wait (!%p800_p3), %s617_s29, 16  }
 0x1ba   : > { %915 = vsyncadd (!%p800_p3), %s617_s29, 4294967280  ;;  %s17_s20 = sadd.s32 1, %s938_s20   ;;  %s1102_s15 = smov %s922_s16 }
 0x1bb   : > { %p14_p5 = scmp.ge.s32.totalorder %s17_s20, 4   ;;  %s1103_s16 = smov %s926_s17 }
 0x1bc   : > { %s1104_s17 = smov %s1019_s28  ;;  %s1105_s18 = smov %s934_s19 }
 0x1bd   : > { %s1106_s19 = smov %s1108_s23  ;;  %16 = sbr.rel (!%p14_p5) target bundleno = 4 (0x4), region = 90 }
 0x1c4   :  { %621 = vsyncpa [#allocation3], 1 }
 0x1c5   :  { %623 = vsyncpa [#allocation3 + $0x1], 1 }

</bundles_post_ra>
